<compile_context>
chip_gen: v6e
topology: v6e:2x2x1
jax: 0.10.0
libtpu: 0.0.40
codegen_flags: <defaults>
</compile_context>

<pallas_src>
import functools

import jax
import jax.numpy as jnp
from jax import lax
from jax.experimental import pallas as pl
from jax.experimental.pallas import tpu as pltpu


# --------------------------------------------------------------------------
# Kernel
# --------------------------------------------------------------------------
def _tent_step_kernel(x_ref, w_ref, b_ref,              # inputs
                      out_ref, gw_ref, gb_ref,          # outputs
                      *, wt, grad_scale, batch, tiles_per_core,
                      classes, mask_rows, mask_cols):
    c = pl.program_id(0)          # core / parallel axis
    i = pl.program_id(1)          # batch-tile / reduction axis

    # ---- init per-core resident gradient accumulators on the first tile ---
    @pl.when(i == 0)
    def _init():
        gw_ref[...] = jnp.zeros_like(gw_ref)
        gb_ref[...] = jnp.zeros_like(gb_ref)

    x = x_ref[...]                                       # [TB, Hp] bf16

    # ---- model forward: z = x @ W + b  (W pre-cast to bf16 in wrapper) ----
    z = jnp.dot(x, w_ref[...], preferred_element_type=jnp.float32) + b_ref[...]
    out_ref[...] = z                                     # [TB, Cp] f32

    tb, cp = out_ref.shape

    # ---- softmax entropy of (wt * z), numerically stable -------------------
    u = z if wt == 1.0 else jnp.float32(wt) * z
    if mask_cols:
        # NOTE: finite sentinel (NOT -inf): exp underflows to exactly 0 for
        # padded lanes so p = 0 and p*logp = 0 without producing NaNs.
        col_ids = lax.broadcasted_iota(jnp.int32, (tb, cp), 1)
        u = jnp.where(col_ids < classes, u, jnp.float32(-1e30))
    m = jnp.max(u, axis=1, keepdims=True)
    us = u - m
    eu = jnp.exp(us)
    s = jnp.sum(eu, axis=1, keepdims=True)
    logp = us - jnp.log(s)
    p = eu * (1.0 / s)            # exact reciprocal: p feeds the gradient
    ent = -jnp.sum(p * logp, axis=1, keepdims=True)      # [TB, 1]

    # ---- analytic backward, pre-scaled by -lr*wt/batch (grad_scale) --------
    #   dH/du_j = -p_j (log p_j + H)   =>   delta_z = grad_scale * p*(logp+H)
    g = jnp.float32(grad_scale) * (p * (logp + ent))     # [TB, Cp]
    if mask_rows:
        row_ids = ((c * tiles_per_core + i) * tb
                   + lax.broadcasted_iota(jnp.int32, (tb, 1), 0))
        g = jnp.where(row_ids < batch, g, 0.0)

    # dW partial = x^T @ g without materializing x.T (contract batch axis).
    dW = lax.dot_general(x, g.astype(jnp.bfloat16),
                         dimension_numbers=(((0,), (0,)), ((), ())),
                         preferred_element_type=jnp.float32)   # [Hp, Cp]
    gw_ref[...] += dW[jnp.newaxis]
    gb_ref[...] += jnp.sum(g, axis=0, keepdims=True)[jnp.newaxis]


# --------------------------------------------------------------------------
# Padded single step (jitted)
# --------------------------------------------------------------------------
@functools.partial(
    jax.jit,
    static_argnames=("lr", "wt", "batch", "classes", "tile_b",
                     "num_cores", "tiles_per_core", "vmem_limit"),
    donate_argnums=(1, 2))
def _tent_step_padded(x_p, w_p, b_p, *, lr, wt, batch, classes,
                      tile_b, num_cores, tiles_per_core, vmem_limit):
    Bp, Hp = x_p.shape
    Cp = w_p.shape[1]
    assert Bp == num_cores * tiles_per_core * tile_b

    kernel = functools.partial(
        _tent_step_kernel,
        wt=wt,
        grad_scale=lr * wt / batch,        # fold lr, wt and 1/batch once
        batch=batch,
        tiles_per_core=tiles_per_core,
        classes=classes,
        mask_rows=(Bp != batch),
        mask_cols=(Cp != classes))

    # Cast W to bf16 ONCE per step (not per grid tile on the VPU).
    w_bf16 = w_p.astype(jnp.bfloat16)

    out, gw, gb = pl.pallas_call(
        kernel,
        out_shape=(
            jax.ShapeDtypeStruct((Bp, Cp), jnp.float32),            # logits z
            jax.ShapeDtypeStruct((num_cores, Hp, Cp), jnp.float32),  # dW parts
            jax.ShapeDtypeStruct((num_cores, 1, Cp), jnp.float32),   # db parts
        ),
        grid=(num_cores, tiles_per_core),
        in_specs=[
            pl.BlockSpec((tile_b, Hp), lambda c, i: (c * tiles_per_core + i, 0)),
            pl.BlockSpec((Hp, Cp), lambda c, i: (0, 0)),            # W (bf16)
            pl.BlockSpec((1, Cp), lambda c, i: (0, 0)),             # b
        ],
        out_specs=(
            pl.BlockSpec((tile_b, Cp), lambda c, i: (c * tiles_per_core + i, 0)),
            pl.BlockSpec((1, Hp, Cp), lambda c, i: (c, 0, 0)),      # resident
            pl.BlockSpec((1, 1, Cp), lambda c, i: (c, 0, 0)),       # resident
        ),
        compiler_params=pltpu.CompilerParams(
            dimension_semantics=("parallel", "arbitrary"),
            vmem_limit_bytes=vmem_limit),
    )(x_p, w_bf16, b_p)

    # Tiny fused epilogue: combine per-core partials and apply the SGD update
    # (partials are already scaled by -lr*wt/batch, so it is a plain add).
    w_new = w_p + jnp.sum(gw, axis=0)
    b_new = b_p + jnp.sum(gb, axis=0)
    return out, w_new, b_new


# --------------------------------------------------------------------------
# Wrapper helpers
# --------------------------------------------------------------------------
@functools.lru_cache(maxsize=1)
def _vmem_limit_bytes():
    # v5e/v6e have 128 MiB VMEM per TensorCore, v7x only 64 MiB; leave
    # headroom for Mosaic-internal scratch.
    try:
        cap = int(pltpu.get_tpu_info().vmem_capacity_bytes)
    except Exception:
        cap = 64 * 1024 * 1024
    return int(min(cap - 16 * 1024 * 1024, 96 * 1024 * 1024))


def _pad_inputs(x, w, b, tile_b):
    B, H = x.shape
    C = w.shape[-1]
    Hp = max(128, pl.cdiv(H, 128) * 128)       # lane-dense contraction dim
    Cp = max(128, pl.cdiv(C, 128) * 128)       # lane-dense class dim
    tb = min(int(tile_b), pl.cdiv(B, 16) * 16)
    tb = max(16, pl.cdiv(tb, 16) * 16)         # bf16 sublane packing
    num_tiles = pl.cdiv(B, tb)
    num_cores = 2 if num_tiles >= 2 else 1     # v7x: split batch across TCs
    tiles_per_core = pl.cdiv(num_tiles, num_cores)
    Bp = num_cores * tiles_per_core * tb

    x_p = jnp.pad(x.astype(jnp.bfloat16), ((0, Bp - B), (0, Hp - H)))
    w_p = jnp.pad(jnp.asarray(w, jnp.float32).reshape(H, C),
                  ((0, Hp - H), (0, Cp - C)))
    b_p = jnp.pad(jnp.asarray(b, jnp.float32).reshape(1, C),
                  ((0, 0), (0, Cp - C)))
    cfg = dict(tile_b=tb, num_cores=num_cores, tiles_per_core=tiles_per_core)
    return x_p, w_p, b_p, cfg


def tent_step(x, w, b, weight_scalar, *, lr, tile_b=512):
    """One forward_and_adapt step. Returns (outputs, w_new, b_new)."""
    B, H = x.shape
    C = w.shape[-1]
    wt = float(weight_scalar) if weight_scalar else 1.0
    x_p, w_p, b_p, cfg = _pad_inputs(x, w, b, tile_b)
    out_p, w_new_p, b_new_p = _tent_step_padded(
        x_p, w_p, b_p, lr=float(lr), wt=wt, batch=B, classes=C,
        vmem_limit=_vmem_limit_bytes(), **cfg)
    return out_p[:B, :C], w_new_p[:H, :C], b_new_p[:, :C]


class TentPallas:
    """Tent: adapt a linear model by entropy minimization on every forward."""

    def __init__(self, w, b, *, lr=1e-3, steps=1, episodic=False, tile_b=512):
        assert steps > 0, "tent requires >= 1 step(s) to forward and update"
        self.lr = float(lr)
        self.steps = steps
        self.episodic = episodic
        self.tile_b = tile_b
        self.w = jnp.asarray(w, jnp.float32)
        self.b = jnp.asarray(b, jnp.float32).reshape(1, -1)
        # copy_model_and_optimizer (plain SGD has no optimizer state to copy).
        self._w0, self._b0 = self.w, self.b

    def reset(self):
        # load_model_and_optimizer
        self.w, self.b = self._w0, self._b0

    def forward(self, x, weight=None):
        if self.episodic:
            self.reset()
        wt = float(weight) if weight else 1.0   # matches torch `if weight:`
        B, H = x.shape
        C = self.w.shape[1]

        # Pad once, keep padded W/b across steps, slice once at the end.
        x_p, w_p, b_p, cfg = _pad_inputs(x, self.w, self.b, self.tile_b)
        vmem_limit = _vmem_limit_bytes()
        out_p = None
        # TODO(synk): for steps > 1, skip the HBM writeback of `outputs` on
        # non-final steps (or fold the loop into lax.fori_loop around the call).
        for _ in range(self.steps):
            out_p, w_p, b_p = _tent_step_padded(
                x_p, w_p, b_p, lr=self.lr, wt=wt, batch=B, classes=C,
                vmem_limit=vmem_limit, **cfg)
        self.w = w_p[:H, :C]
        self.b = b_p[:, :C]
        return out_p[:B, :C]

    __call__ = forward


# --------------------------------------------------------------------------
# Pure-JAX reference of one forward_and_adapt step
# --------------------------------------------------------------------------
def _reference_step(x, w, b, wt, lr, matmul_dtype=jnp.float32):
    def loss_fn(params):
        w_, b_ = params
        z = jnp.dot(x.astype(matmul_dtype), w_.astype(matmul_dtype),
                    preferred_element_type=jnp.float32) + b_.reshape(1, -1)
        u = wt * z
        logp = jax.nn.log_softmax(u, axis=1)
        p = jax.nn.softmax(u, axis=1)
        return (-(p * logp).sum(1)).mean(0), z
    (loss, z), grads = jax.value_and_grad(loss_fn, has_aux=True)((w, b))
    return z, w - lr * grads[0], b - lr * grads[1], loss


if __name__ == "__main__":
    key = jax.random.PRNGKey(0)
    kx, kw = jax.random.split(key)

    # Batch not a tile multiple, H and C not lane-aligned: exercises H/C
    # padding, row masking, multi-tile accumulation and the 2-core partials.
    B, H, C = 200, 96, 10
    x = jax.random.normal(kx, (B, H), dtype=jnp.float32)
    w = 0.1 * jax.random.normal(kw, (H, C), dtype=jnp.float32)
    b = jnp.zeros((1, C), dtype=jnp.float32)

    tent = TentPallas(w, b, lr=1e-3, steps=1, episodic=False, tile_b=64)
    outputs = tent(x)                       # forward + adapt (updates tent.w/b)
    jax.block_until_ready(outputs)

    # Sanity check against a pure-JAX reference using the same bf16-input
    # matmuls (the kernel keeps f32 accumulation and f32 master weights).
    ref_out, ref_w, ref_b, _ = _reference_step(
        x, w, b, 1.0, 1e-3, matmul_dtype=jnp.bfloat16)
    assert outputs.shape == (B, C)
    assert jnp.allclose(outputs, ref_out, atol=1e-3, rtol=1e-3)
    assert jnp.allclose(tent.w, ref_w, atol=1e-4, rtol=1e-4)
    assert jnp.allclose(tent.b, ref_b, atol=1e-4, rtol=1e-4)

    # Exercise the multi-step + weighted-entropy path (no reference needed).
    tent2 = TentPallas(w, b, lr=1e-3, steps=2, episodic=True, tile_b=64)
    out2 = tent2(x, weight=0.5)
    jax.block_until_ready(out2)
    assert out2.shape == (B, C)

    print("KERNEL_OK")
</pallas_src>

<mosaic_0001>
module attributes {stable_mosaic.version = 11 : i64} {
  func.func @_tent_step_kernel(%arg0: i32, %arg1: i32, %arg2: memref<64x128xbf16, #tpu.memory_space<vmem>>, %arg3: memref<128x128xbf16, #tpu.memory_space<vmem>>, %arg4: memref<1x128xf32, #tpu.memory_space<vmem>>, %arg5: memref<64x128xf32, #tpu.memory_space<vmem>>, %arg6: memref<1x128x128xf32, #tpu.memory_space<vmem>>, %arg7: memref<1x1x128xf32, #tpu.memory_space<vmem>>) attributes {dimension_semantics = [#tpu.dimension_semantics<parallel>, #tpu.dimension_semantics<arbitrary>], iteration_bounds = array<i64: 2, 2>, scalar_prefetch = 0 : i64, scratch_operands = 0 : i64, tpu.core_type = #tpu.core_type<tc>, window_params = [{transform_indices = @transform_0, window_bounds = array<i64: 64, 128>}, {pipeline_mode = #tpu.pipeline_mode<synchronous>, transform_indices = @transform_1, window_bounds = array<i64: 128, 128>}, {pipeline_mode = #tpu.pipeline_mode<synchronous>, transform_indices = @transform_2, window_bounds = array<i64: 1, 128>}, {transform_indices = @transform_3, window_bounds = array<i64: 64, 128>}, {transform_indices = @transform_4, window_bounds = array<i64: 1, 128, 128>}, {transform_indices = @transform_5, window_bounds = array<i64: 1, 1, 128>}]} {
    %c0_i32 = arith.constant 0 : i32
    %0 = arith.cmpi eq, %arg1, %c0_i32 : i32
    %1 = arith.extui %0 : i1 to i32
    %c0_i32_0 = arith.constant 0 : i32
    %2 = arith.cmpi ne, %1, %c0_i32_0 : i32
    scf.if %2 {
      %cst_30 = arith.constant 0.000000e+00 : f32
      %63 = vector.broadcast %cst_30 : f32 to vector<1x128x128xf32>
      %c0_31 = arith.constant 0 : index
      %c0_32 = arith.constant 0 : index
      %c0_33 = arith.constant 0 : index
      %64 = vector.load %arg6[%c0_31, %c0_32, %c0_33] : memref<1x128x128xf32, #tpu.memory_space<vmem>>, vector<1x128x128xf32>
      tpu.vector_store %arg6[%c0_31, %c0_32, %c0_33], %63 {strides = array<i32>} : memref<1x128x128xf32, #tpu.memory_space<vmem>>, vector<1x128x128xf32>,
      %cst_34 = arith.constant 0.000000e+00 : f32
      %65 = vector.broadcast %cst_34 : f32 to vector<1x1x128xf32>
      %c0_35 = arith.constant 0 : index
      %c0_36 = arith.constant 0 : index
      %c0_37 = arith.constant 0 : index
      %66 = vector.load %arg7[%c0_35, %c0_36, %c0_37] : memref<1x1x128xf32, #tpu.memory_space<vmem>>, vector<1x1x128xf32>
      tpu.vector_store %arg7[%c0_35, %c0_36, %c0_37], %65 {strides = array<i32>} : memref<1x1x128xf32, #tpu.memory_space<vmem>>, vector<1x1x128xf32>,
    } else {
    }
    %c0 = arith.constant 0 : index
    %c0_1 = arith.constant 0 : index
    %3 = vector.load %arg2[%c0, %c0_1] : memref<64x128xbf16, #tpu.memory_space<vmem>>, vector<64x128xbf16>
    %c0_2 = arith.constant 0 : index
    %c0_3 = arith.constant 0 : index
    %4 = vector.load %arg3[%c0_2, %c0_3] : memref<128x128xbf16, #tpu.memory_space<vmem>>, vector<128x128xbf16>
    %cst = arith.constant dense<0.000000e+00> : vector<64x128xf32>
    %5 = tpu.matmul %3, %4, %cst {dimension_numbers = #tpu.dot_dimension_numbers<[1], [0], [0], [1], [0, 0, 1, 1], [], []>} : vector<64x128xbf16>, vector<128x128xbf16>, vector<64x128xf32> -> vector<64x128xf32>
    %c0_4 = arith.constant 0 : index
    %c0_5 = arith.constant 0 : index
    %6 = vector.load %arg4[%c0_4, %c0_5] : memref<1x128xf32, #tpu.memory_space<vmem>>, vector<1x128xf32>
    %7 = vector.broadcast %6 : vector<1x128xf32> to vector<64x128xf32>
    %8 = arith.addf %5, %7 : vector<64x128xf32>
    %c0_6 = arith.constant 0 : index
    %c0_7 = arith.constant 0 : index
    %9 = vector.load %arg5[%c0_6, %c0_7] : memref<64x128xf32, #tpu.memory_space<vmem>>, vector<64x128xf32>
    tpu.vector_store %arg5[%c0_6, %c0_7], %8 {strides = array<i32>} : memref<64x128xf32, #tpu.memory_space<vmem>>, vector<64x128xf32>,
    %10 = tpu.iota {dimensions = array<i32: 1>} : vector<64x128xi32>
    %c10_i32 = arith.constant 10 : i32
    %11 = vector.broadcast %c10_i32 : i32 to vector<64x128xi32>
    %12 = arith.cmpi slt, %10, %11 : vector<64x128xi32>
    %cst_8 = arith.constant -1.000000e+30 : f32
    %13 = vector.broadcast %cst_8 : f32 to vector<64x128xf32>
    %14 = arith.select %12, %8, %13 : vector<64x128xi1>, vector<64x128xf32>
    %cst_9 = arith.constant dense<0xFF800000> : vector<64xf32>
    %15 = vector.multi_reduction <maximumf>, %14, %cst_9 [1] : vector<64x128xf32> to vector<64xf32>
    %16 = vector.shape_cast %15 : vector<64xf32> to vector<64x1xf32>
    %17 = vector.broadcast %16 : vector<64x1xf32> to vector<64x128xf32>
    %18 = arith.subf %14, %17 : vector<64x128xf32>
    %19 = math.exp %18 : vector<64x128xf32>
    %cst_10 = arith.constant dense<0.000000e+00> : vector<64xf32>
    %20 = vector.multi_reduction <add>, %19, %cst_10 [1] : vector<64x128xf32> to vector<64xf32>
    %21 = vector.shape_cast %20 : vector<64xf32> to vector<64x1xf32>
    %22 = math.log %21 : vector<64x1xf32>
    %23 = vector.broadcast %22 : vector<64x1xf32> to vector<64x128xf32>
    %24 = arith.subf %18, %23 : vector<64x128xf32>
    %cst_11 = arith.constant 1.000000e+00 : f32
    %25 = vector.broadcast %cst_11 : f32 to vector<64x1xf32>
    %26 = arith.divf %25, %21 : vector<64x1xf32>
    %27 = vector.broadcast %26 : vector<64x1xf32> to vector<64x128xf32>
    %28 = arith.mulf %19, %27 : vector<64x128xf32>
    %29 = arith.mulf %28, %24 : vector<64x128xf32>
    %cst_12 = arith.constant dense<0.000000e+00> : vector<64xf32>
    %30 = vector.multi_reduction <add>, %29, %cst_12 [1] : vector<64x128xf32> to vector<64xf32>
    %31 = vector.shape_cast %30 : vector<64xf32> to vector<64x1xf32>
    %cst_13 = arith.constant 0.000000e+00 : f32
    %32 = vector.broadcast %cst_13 : f32 to vector<64x1xf32>
    %33 = arith.subf %32, %31 : vector<64x1xf32>
    %34 = vector.broadcast %33 : vector<64x1xf32> to vector<64x128xf32>
    %35 = arith.addf %24, %34 : vector<64x128xf32>
    %36 = arith.mulf %28, %35 : vector<64x128xf32>
    %cst_14 = arith.constant 5.000000e-06 : f32
    %37 = vector.broadcast %cst_14 : f32 to vector<64x128xf32>
    %38 = arith.mulf %37, %36 : vector<64x128xf32>
    %c2_i32 = arith.constant 2 : i32
    %39 = arith.muli %arg0, %c2_i32 : i32
    %40 = arith.addi %39, %arg1 : i32
    %c64_i32 = arith.constant 64 : i32
    %41 = arith.muli %40, %c64_i32 : i32
    %42 = tpu.iota {dimensions = array<i32: 0>} : vector<64x1xi32>
    %43 = vector.broadcast %41 : i32 to vector<64x1xi32>
    %44 = arith.addi %43, %42 : vector<64x1xi32>
    %c200_i32 = arith.constant 200 : i32
    %45 = vector.broadcast %c200_i32 : i32 to vector<64x1xi32>
    %46 = arith.cmpi slt, %44, %45 : vector<64x1xi32>
    %cst_15 = arith.constant 0.000000e+00 : f32
    %47 = vector.shape_cast %46 : vector<64x1xi1> to vector<64x1xi1>
    %48 = vector.broadcast %47 : vector<64x1xi1> to vector<64x128xi1>
    %49 = vector.broadcast %cst_15 : f32 to vector<64x128xf32>
    %50 = arith.select %48, %38, %49 : vector<64x128xi1>, vector<64x128xf32>
    %51 = arith.truncf %50 : vector<64x128xf32> to vector<64x128xbf16>
    %cst_16 = arith.constant dense<0.000000e+00> : vector<128x128xf32>
    %52 = tpu.matmul %3, %51, %cst_16 {dimension_numbers = #tpu.dot_dimension_numbers<[0], [0], [1], [1], [0, 1, 1, 1], [], []>} : vector<64x128xbf16>, vector<64x128xbf16>, vector<128x128xf32> -> vector<128x128xf32>
    %c0_17 = arith.constant 0 : index
    %c0_18 = arith.constant 0 : index
    %c0_19 = arith.constant 0 : index
    %53 = vector.load %arg6[%c0_17, %c0_18, %c0_19] : memref<1x128x128xf32, #tpu.memory_space<vmem>>, vector<1x128x128xf32>
    %54 = vector.shape_cast %52 : vector<128x128xf32> to vector<1x128x128xf32>
    %55 = arith.addf %53, %54 : vector<1x128x128xf32>
    %c0_20 = arith.constant 0 : index
    %c0_21 = arith.constant 0 : index
    %c0_22 = arith.constant 0 : index
    %56 = vector.load %arg6[%c0_20, %c0_21, %c0_22] : memref<1x128x128xf32, #tpu.memory_space<vmem>>, vector<1x128x128xf32>
    tpu.vector_store %arg6[%c0_20, %c0_21, %c0_22], %55 {strides = array<i32>} : memref<1x128x128xf32, #tpu.memory_space<vmem>>, vector<1x128x128xf32>,
    %c0_23 = arith.constant 0 : index
    %c0_24 = arith.constant 0 : index
    %c0_25 = arith.constant 0 : index
    %57 = vector.load %arg7[%c0_23, %c0_24, %c0_25] : memref<1x1x128xf32, #tpu.memory_space<vmem>>, vector<1x1x128xf32>
    %cst_26 = arith.constant dense<0.000000e+00> : vector<128xf32>
    %58 = vector.multi_reduction <add>, %50, %cst_26 [0] : vector<64x128xf32> to vector<128xf32>
    %59 = vector.shape_cast %58 : vector<128xf32> to vector<1x128xf32>
    %60 = vector.shape_cast %59 : vector<1x128xf32> to vector<1x1x128xf32>
    %61 = arith.addf %57, %60 : vector<1x1x128xf32>
    %c0_27 = arith.constant 0 : index
    %c0_28 = arith.constant 0 : index
    %c0_29 = arith.constant 0 : index
    %62 = vector.load %arg7[%c0_27, %c0_28, %c0_29] : memref<1x1x128xf32, #tpu.memory_space<vmem>>, vector<1x1x128xf32>
    tpu.vector_store %arg7[%c0_27, %c0_28, %c0_29], %61 {strides = array<i32>} : memref<1x1x128xf32, #tpu.memory_space<vmem>>, vector<1x1x128xf32>,
    return
  }
  func.func @transform_0(%arg0: i32, %arg1: i32) -> (i32, i32) {
    %c2_i32 = arith.constant 2 : i32
    %0 = arith.muli %arg0, %c2_i32 : i32
    %1 = arith.addi %0, %arg1 : i32
    %c0_i32 = arith.constant 0 : i32
    %c0_i32_0 = arith.constant 0 : i32
    return %1, %c0_i32 : i32, i32
  }
  func.func @transform_1(%arg0: i32, %arg1: i32) -> (i32, i32) {
    %c0_i32 = arith.constant 0 : i32
    %c0_i32_0 = arith.constant 0 : i32
    %c0_i32_1 = arith.constant 0 : i32
    return %c0_i32, %c0_i32_0 : i32, i32
  }
  func.func @transform_2(%arg0: i32, %arg1: i32) -> (i32, i32) {
    %c0_i32 = arith.constant 0 : i32
    %c0_i32_0 = arith.constant 0 : i32
    %c0_i32_1 = arith.constant 0 : i32
    return %c0_i32, %c0_i32_0 : i32, i32
  }
  func.func @transform_3(%arg0: i32, %arg1: i32) -> (i32, i32) {
    %c2_i32 = arith.constant 2 : i32
    %0 = arith.muli %arg0, %c2_i32 : i32
    %1 = arith.addi %0, %arg1 : i32
    %c0_i32 = arith.constant 0 : i32
    %c0_i32_0 = arith.constant 0 : i32
    return %1, %c0_i32 : i32, i32
  }
  func.func @transform_4(%arg0: i32, %arg1: i32) -> (i32, i32, i32) {
    %c0_i32 = arith.constant 0 : i32
    %c0_i32_0 = arith.constant 0 : i32
    %c0_i32_1 = arith.constant 0 : i32
    return %arg0, %c0_i32, %c0_i32_0 : i32, i32, i32
  }
  func.func @transform_5(%arg0: i32, %arg1: i32) -> (i32, i32, i32) {
    %c0_i32 = arith.constant 0 : i32
    %c0_i32_0 = arith.constant 0 : i32
    %c0_i32_1 = arith.constant 0 : i32
    return %arg0, %c0_i32, %c0_i32_0 : i32, i32, i32
  }
}

</mosaic_0001>

<bundles_post_ra>
// kernel: _tent_step_padded.1
= control target key start
LH: loop header
LB: loop body
LE: loop exit
PB: predicated region body
PF: predicated region fallthrough
CT: control target
= control target key end

     0   :  { %11 = vsyncpa [#allocation3], 0  ;;  %s1866_s0 = inlined_call_operand.vmem [shape: bf16[256,128], index: 0, kind: input, shape index: {}]   ;;  %s1867_s1 = inlined_call_operand.vmem [shape: bf16[128,128], index: 1, kind: input, shape index: {}]   ;;  %s1868_s2 = inlined_call_operand.vmem [shape: f32[1,128], index: 2, kind: input, shape index: {}]   ;;  %s1869_s3 = inlined_call_operand.hbm [shape: f32[256,128], index: 3, kind: output, shape index: {0}]   ;;  %s1870_s4 = inlined_call_operand.vmem [shape: f32[2,128,128], index: 4, kind: output, shape index: {1}]   ;;  %s1871_s5 = inlined_call_operand.vmem [shape: f32[2,1,128], index: 5, kind: output, shape index: {2}]  }
   0x1   :  { %13 = vsyncpa [#allocation3 + $0x1], 0  ;;  %s1450_s18 = smov 0   ;;  %s1452_s19 = smov 0  }
   0x2   :  { %s1454_s20 = smov 0   ;;  %s1456_s21 = smov 0  }
   0x3   :  { %s1458_s22 = smov 0   ;;  %s1460_s23 = smov 0  }
   0x4   :  { %s1462_s24 = smov 0   ;;  %s1464_s25 = smov 0  }
   0x5 LB: > { %1876 = sst [smem:[#allocation5_spill]] %s1410_s24  ;;  %s1056_s26 = sadd.s32 4294967295, %s1414_s25   ;;  %s1414_s25 = sphi %s1464_s25, %s19_s25   ;;  %s1410_s24 = sphi %s1462_s24, %s1888_s24   ;;  %s1406_s23 = sphi %s1460_s23, %s1893_s23   ;;  %s1402_s22 = sphi %s1458_s22, %s1886_s22   ;;  %s1398_s21 = sphi %s1456_s21, %s1892_s21   ;;  %s1394_s20 = sphi %s1454_s20, %s1891_s20   ;;  %s1390_s19 = sphi %s1452_s19, %s1890_s19   ;;  %s1386_s18 = sphi %s1450_s18, %s1889_s18  }
   0x6   : > { %s28_s27 = sadd.s32 1, %s1406_s23  ;;  %s31_s28 = sadd.s32 1, %s1410_s24 }
   0x7   : > { %p29_p0 = scmp.ge.s32.totalorder %s28_s27, 2  ;;  %s1060_s29 = sshll.u32 %s1410_s24, 1 }
   0x8   : > { %s1057_s30 = sadd.s32 4294967294, %s1414_s25   ;;  %s108_s6 = sadd.s32 %s1406_s23, %s1060_s29 }
   0x9   : > { %s1895_s27 = smov (%p29_p0, %s28_s27), 0  ;;  %s1897_s28 = smov (!%p29_p0, %s31_s28), %s1410_s24 }
   0xa   : > { %1877 = sst [smem:[#allocation6_spill]] %s1895_s27  ;;  %p124_p1 = scmp.ne.s32.totalorder %s1394_s20, %s1390_s19 }
   0xb   : > { %p125_p2 = scmp.eq.s32.totalorder %s1056_s26, 3  ;;  %p33_p3 = scmp.ge.s32.totalorder %s1897_s28, 2 }
   0xc   : > { %p130_p4 = scmp.ne.s32.totalorder %s1390_s19, %s1386_s18  ;;  %p131_p6 = scmp.eq.s32.totalorder %s1057_s30, 3 }
   0xd   : > { %p1503_p5 = por %p125_p2, %p124_p1  ;;  %s1899_s28 = smov (%p33_p3, %s1897_s28), 0 }
   0xe   : > { %1879 = sst [smem:[#allocation7_spill]] %s1899_s28  ;;  %p1509_p7 = por %p131_p6, %p130_p4 }
   0xf   : > { %p1064_p8 = scmp.ge.s32.totalorder %s1414_s25, 1  ;;  %s1061_s9 = sshll.u32 %s1899_s28, 1 }
  0x10   : > { %p220_p9 = scmp.lt.s32.totalorder %s1414_s25, 5  ;;  %s110_s10 = sadd.s32 %s1061_s9, %s1895_s27 }
  0x11   : > { %s114_s11 = sadd.s32 1, %s1394_s20  ;;  %s111_s12 = ssub.s32 %s108_s6, %s110_s10 }
  0x12   : > { %p221_p10 = pnand %p1064_p8, %p220_p9  ;;  %p112_p11 = scmp.eq.s32.totalorder %s111_s12, 0 }
  0x13   : > { %s1873_s14 = sand.u32 (!%p221_p10), 1, %s1390_s19   ;;  %s1066_s15 = sshll.u32 (!%p221_p10), %s1402_s22, 1 }
  0x14   : > { %s1519_s13 = scalar_select %p112_p11, %s1394_s20, %s114_s11  }
  0x15   : > { %224 = sbr.rel (%p221_p10) target bundleno = 999 (0x3e7), region = 32  ;;  %s1065_s16 = sshll.u32 (!%p221_p10), %s1873_s14, 6 }
  0x16   : > { %s1526_s17 = sadd.s32 (!%p221_p10), %s1398_s21, %s1066_s15  ;;  %p271_p13 = scmp.lt.s32.totalorder (!%p221_p10), %s1402_s22, 1 }
  0x17   : > { %s1067_s26 = sshll.u32 (!%p221_p10), %s1526_s17, 3  ;;  %s1546_s24 = scalar_lea.vmem (!%p221_p10), [#allocation2], %s1065_s16 }
  0x18   : > { %p261_p12 = scmp.lt.s32.totalorder (!%p221_p10), %s1067_s26, 31  ;;  %p1071_p0 = scmp.ne.s32.totalorder (!%p221_p10), %s1398_s21, 0 }
  0x1a   : > { %s1901_s26 = smov (!%p261_p12, %s1067_s26), 31  ;;  %s1903_s22 = smov (!%p271_p13, %s1402_s22), 1 }
  0x1b   : > { %s1068_s29 = sshll.u32 %s1901_s26, 2  ;;  %s1113_s10 = sshll.u32 %s1903_s22, 7 }
  0x1c   : > { %s1534_s9 = scalar_lea.vmem %s1866_s0, %s1068_s29  ;;  %s1539_s28 = scalar_lea.vmem %s1870_s4, %s1113_s10 }
  0x1d   : > { %s1544_s27 = scalar_lea.vmem %s1871_s5, %s1903_s22  ;;  %283 = sbr.rel (%p1071_p0) target bundleno = 44 (0x2c), region = 36 }
  0x22   : > { %v1416_v0 = vmov 0.0  }
  0x23   : > { %284 = vst [vmem:[%s1539_s28] sm:$0xff] %v1416_v0  ;;  %285 = vst [vmem:[%s1539_s28 + $0x8] sm:$0xff] %v1416_v0 }
  0x24   : > { %286 = vst [vmem:[%s1539_s28 + $0x10] sm:$0xff] %v1416_v0  ;;  %287 = vst [vmem:[%s1539_s28 + $0x18] sm:$0xff] %v1416_v0 }
  0x25   : > { %288 = vst [vmem:[%s1539_s28 + $0x20] sm:$0xff] %v1416_v0  ;;  %289 = vst [vmem:[%s1539_s28 + $0x28] sm:$0xff] %v1416_v0 }
  0x26   : > { %290 = vst [vmem:[%s1539_s28 + $0x30] sm:$0xff] %v1416_v0  ;;  %291 = vst [vmem:[%s1539_s28 + $0x38] sm:$0xff] %v1416_v0 }
  0x27   : > { %292 = vst [vmem:[%s1539_s28 + $0x40] sm:$0xff] %v1416_v0  ;;  %293 = vst [vmem:[%s1539_s28 + $0x48] sm:$0xff] %v1416_v0 }
  0x28   : > { %294 = vst [vmem:[%s1539_s28 + $0x50] sm:$0xff] %v1416_v0  ;;  %295 = vst [vmem:[%s1539_s28 + $0x58] sm:$0xff] %v1416_v0 }
  0x29   : > { %296 = vst [vmem:[%s1539_s28 + $0x60] sm:$0xff] %v1416_v0  ;;  %297 = vst [vmem:[%s1539_s28 + $0x68] sm:$0xff] %v1416_v0 }
  0x2a   : > { %298 = vst [vmem:[%s1539_s28 + $0x70] sm:$0xff] %v1416_v0  ;;  %299 = vst [vmem:[%s1539_s28 + $0x78] sm:$0xff] %v1416_v0 }
  0x2b   : > { %300 = vst [vmem:[%s1544_s27] sm:$0x1] %v1416_v0 }
  0x2c PF: > { %v1262_v1 = vld [vmem:[%s1867_s1 + $0x38] sm:$0xff]   ;;  %v1263_v2 = vld [vmem:[%s1867_s1 + $0x30] sm:$0xff]   ;;  %v1264_v3 = vld [vmem:[%s1867_s1 + $0x28] sm:$0xff]   ;;  %v477_v17 = vlaneseq  ;;  %vm721_vm7 = vcmask 523264   ;;  %s1114_s30 = sshll.u32 %s1526_s17, 10  ;;  %s931_s6 = sshll.u32 %s1546_s24, 4  ;;  %s1779_s6 = int_to_ptr.vmem [resolvable:$true] %s931_s6 }
  0x2d   : > { %1139 = vmatprep.subr.bf16.mxu0 %v1262_v1  ;;  %v1265_v4 = vld [vmem:[%s1867_s1 + $0x20] sm:$0xff]   ;;  %v1266_v6 = vld [vmem:[%s1867_s1 + $0x18] sm:$0xff]   ;;  %v1267_v7 = vld [vmem:[%s1867_s1 + $0x10] sm:$0xff]   ;;  %s1777_s12 = scalar_lea.hbm %s1869_s3, %s1114_s30  ;;  %s1885_s15 = sand.u32 1, %s1390_s19  }
  0x2e   : > { %1140 = vmatpush3.bf16.msra.mxu0 %v1262_v1  ;;  %v1579_v5 = vld [vmem:[%s1534_s9] sm:$0xff]   ;;  %v1268_v8 = vld [vmem:[%s1867_s1 + $0x8] sm:$0xff]   ;;  %v1598_v11 = vld [vmem:[%s1534_s9 + $0x10] sm:$0xff]   ;;  %v478_v22 = vand.u32 127, %v477_v17  ;;  %s1783_s21 = scalar_lea.sflag [#allocation3], %s1885_s15  ;;  %s1322_s22 = scalar_lea.vmem %s1779_s6, 1024 }
  0x2f   : > { %1141 = vmatprep.subr.bf16.mxu0 %v1263_v2  ;;  %1155 = vmatprep.mubr.bf16.mxu0 %v1579_v5  ;;  %v1269_v9 = vld [vmem:[%s1867_s1] sm:$0xff]   ;;  %v1595_v10 = vld [vmem:[%s1534_s9 + $0x8] sm:$0xff]   ;;  %v1603_v12 = vld [vmem:[%s1534_s9 + $0x18] sm:$0xff]   ;;  %s1086_s9 = sshll.u32 %s1526_s17, 6  ;;  %p1323_p1 = scmp.ne.s32.totalorder %s1779_s6, %s1322_s22 }
  0x30   : > { %v1072_v13 = vld [vmem:[%s1868_s2] ss:$0 sm:$0xff]  ;;  %vm479_vm0 = vcmp.lt.s32.totalorder %v478_v22, 10 }
  0x31   : > { %p1324_p2 = pnand %p1323_p1, %p1503_p5 }
  0x32   : > { %1142 = vmatpush3.bf16.msra.mxu0 %v1263_v2 }
  0x33   : > { %1143 = vmatprep.subr.bf16.mxu0 %v1264_v3  ;;  %p1325_p3 = pneg %p1324_p2 }
  0x36   : > { %1144 = vmatpush3.bf16.msra.mxu0 %v1264_v3 }
  0x37   : > { %1145 = vmatprep.subr.bf16.mxu0 %v1265_v4 }
  0x3a   : > { %1146 = vmatpush3.bf16.msra.mxu0 %v1265_v4 }
  0x3b   : > { %1147 = vmatprep.subr.bf16.mxu0 %v1266_v6 }
  0x3e   : > { %1148 = vmatpush3.bf16.msra.mxu0 %v1266_v6 }
  0x3f   : > { %1149 = vmatprep.subr.bf16.mxu0 %v1267_v7 }
  0x42   : > { %1150 = vmatpush3.bf16.msra.mxu0 %v1267_v7 }
  0x43   : > { %1151 = vmatprep.subr.bf16.mxu0 %v1268_v8 }
  0x46   : > { %1152 = vmatpush3.bf16.msra.mxu0 %v1268_v8 }
  0x47   : > { %1153 = vmatprep.subr.bf16.mxu0 %v1269_v9 }
  0x4a   : > { %1154 = vmatpush3.bf16.msra.mxu0 %v1269_v9 }
  0x4d   : > { %1156 = vmatmul.mubr.bf16.vlgmr.msra.gmra.mxu0 %v1595_v10 }
  0x4e   : > { %1159 = vmatprep.mubr.bf16.mxu0 %v1598_v11 }
  0x55   : > { %1160 = vmatmul.mubr.bf16.gmra.mxu0 %v1603_v12 }
 0x10d   : > { %v1157_v14 = vpop.f32.mrf.mxu0 }
 0x10e   : > { %v447_v15 = vadd.f32 %v1157_v14, %v1072_v13 }
 0x10f   : > { %v438_v16 = vpop.f32.mrf.mxu0 }
 0x110   : > { %471 = vst [vmem:[%s1546_s24 + $0x10] sm:$0xff] %v447_v15  ;;  %v439_v18 = vadd.f32 %v1072_v13, %v438_v16  ;;  %v482_v36 = vsel %vm479_vm0, %v447_v15, -1e+30 }
 0x111   : > { %v1158_v19 = vpop.f32.mrf.mxu0 }
 0x112   : > { %469 = vst [vmem:[%s1546_s24] sm:$0xff] %v439_v18  ;;  %v450_v20 = vadd.f32 %v1158_v19, %v1072_v13  ;;  %v480_v38 = vsel %vm479_vm0, %v439_v18, -1e+30 }
 0x113   : > { %v441_v21 = vpop.f32.mrf.mxu0 }
 0x114   : > { %472 = vst [vmem:[%s1546_s24 + $0x18] sm:$0xff] %v450_v20  ;;  %v442_v23 = vadd.f32 %v1072_v13, %v441_v21  ;;  %v483_v37 = vsel %vm479_vm0, %v450_v20, -1e+30 }
 0x115   : > { %v1161_v24 = vpop.f32.mrf.mxu0 }
 0x116   : > { %470 = vst [vmem:[%s1546_s24 + $0x8] sm:$0xff] %v442_v23  ;;  %v463_v25 = vadd.f32 %v1161_v24, %v1072_v13  ;;  %v481_v39 = vsel %vm479_vm0, %v442_v23, -1e+30 }
 0x117   : > { %v454_v26 = vpop.f32.mrf.mxu0 }
 0x118   : > { %475 = vst [vmem:[%s1546_s24 + $0x30] sm:$0xff] %v463_v25  ;;  %v455_v27 = vadd.f32 %v1072_v13, %v454_v26  ;;  %v486_v28 = vsel %vm479_vm0, %v463_v25, -1e+30 }
 0x119   : > { %500 = vmax.xlane.f32.xlu0 %v486_v28  ;;  %v1162_v29 = vpop.f32.mrf.mxu0 }
 0x11a   : > { %473 = vst [vmem:[%s1546_s24 + $0x20] sm:$0xff] %v455_v27  ;;  %v466_v30 = vadd.f32 %v1162_v29, %v1072_v13  ;;  %v484_v31 = vsel %vm479_vm0, %v455_v27, -1e+30 }
 0x11b   : > { %v457_v32 = vpop.f32.mrf.mxu0  ;;  %496 = vmax.xlane.f32.xlu1 %v484_v31 }
 0x11c   : > { %476 = vst [vmem:[%s1546_s24 + $0x38] sm:$0xff] %v466_v30  ;;  %v458_v33 = vadd.f32 %v1072_v13, %v457_v32  ;;  %v487_v34 = vsel %vm479_vm0, %v466_v30, -1e+30 }
 0x11d   : > { %502 = vmax.xlane.f32.xlu0 %v487_v34 }
 0x11e   : > { %474 = vst [vmem:[%s1546_s24 + $0x28] sm:$0xff] %v458_v33  ;;  %v485_v35 = vsel %vm479_vm0, %v458_v33, -1e+30 }
 0x11f   : > { %498 = vmax.xlane.f32.xlu1 %v485_v35 }
 0x121   : > { %492 = vmax.xlane.f32.xlu0 %v482_v36 }
 0x123   : > { %494 = vmax.xlane.f32.xlu1 %v483_v37 }
 0x125   : > { %488 = vmax.xlane.f32.xlu0 %v480_v38 }
 0x127   : > { %490 = vmax.xlane.f32.xlu1 %v481_v39 }
 0x1a2   : > { %v501_v40 = vpop.xlane.xlu0 %500 }
 0x1a3   : > { %v1626_v41 = vsub.f32 %v486_v28, %v501_v40 }
 0x1a4   : > { %v497_v42 = vpop.xlane.xlu1 %496 }
 0x1a5   : > { %v524_v43 = vmul.f32 1.442695, %v1626_v41  ;;  %v1629_v44 = vsub.f32 %v484_v31, %v497_v42 }
 0x1a6   : > { %v503_v45 = vpop.xlane.xlu0 %502 }
 0x1a7   : > { %1274 = vpow2.f32 %v524_v43  ;;  %v520_v46 = vmul.f32 1.442695, %v1629_v44  ;;  %v1632_v47 = vsub.f32 %v487_v34, %v503_v45 }
 0x1a8   : > { %v499_v48 = vpop.xlane.xlu1 %498 }
 0x1a9   : > { %v526_v49 = vmul.f32 1.442695, %v1632_v47  ;;  %v1635_v50 = vsub.f32 %v485_v35, %v499_v48  ;;  %1276 = vpow2.f32 %v520_v46 }
 0x1aa   : > { %v493_v51 = vpop.xlane.xlu0 %492 }
 0x1ab   : > { %1278 = vpow2.f32 %v526_v49  ;;  %v522_v52 = vmul.f32 1.442695, %v1635_v50  ;;  %v1638_v53 = vsub.f32 %v482_v36, %v493_v51 }
 0x1ac   : > { %v495_v54 = vpop.xlane.xlu1 %494 }
 0x1ad   : > { %v516_v55 = vmul.f32 1.442695, %v1638_v53  ;;  %v1641_v56 = vsub.f32 %v483_v37, %v495_v54  ;;  %1280 = vpow2.f32 %v522_v52 }
 0x1ae   : > { %v489_v57 = vpop.xlane.xlu0 %488 }
 0x1af   : > { %1282 = vpow2.f32 %v516_v55  ;;  %v518_v58 = vmul.f32 1.442695, %v1641_v56  ;;  %v1644_v59 = vsub.f32 %v480_v38, %v489_v57 }
 0x1b0   : > { %v491_v60 = vpop.xlane.xlu1 %490 }
 0x1b1   : > { %v512_v61 = vmul.f32 1.442695, %v1644_v59  ;;  %v1647_v62 = vsub.f32 %v481_v39, %v491_v60  ;;  %1284 = vpow2.f32 %v518_v58 }
 0x1b3   : > { %1286 = vpow2.f32 %v512_v61  ;;  %v514_v63 = vmul.f32 1.442695, %v1647_v62 }
 0x1b4   : > { %v1650_v0 = vpop.eup %1274 }
 0x1b5   : > { %540 = vadd.xlane.f32.xlu0 %v1650_v0  ;;  %1288 = vpow2.f32 %v514_v63 }
 0x1b6   : > { %v1653_v1 = vpop.eup %1276 }
 0x1b8   : > { %v1279_v2 = vpop.eup %1278 }
 0x1b9   : > { %542 = vadd.xlane.f32.xlu1 %v1279_v2  ;;  %536 = vadd.xlane.f32.xlu0 %v1653_v1 }
 0x1ba   : > { %v1281_v3 = vpop.eup %1280 }
 0x1bc   : > { %v1283_v4 = vpop.eup %1282 }
 0x1bd   : > { %538 = vadd.xlane.f32.xlu1 %v1281_v3  ;;  %532 = vadd.xlane.f32.xlu0 %v1283_v4 }
 0x1be   : > { %v1285_v6 = vpop.eup %1284 }
 0x1c0   : > { %v1656_v7 = vpop.eup %1286 }
 0x1c1   : > { %534 = vadd.xlane.f32.xlu1 %v1285_v6  ;;  %528 = vadd.xlane.f32.xlu0 %v1656_v7 }
 0x1c2   : > { %v1659_v8 = vpop.eup %1288 }
 0x1c5   : > { %530 = vadd.xlane.f32.xlu1 %v1659_v8 }
 0x23e   : > { %v541_v9 = vpop.xlane.xlu0 %540 }
 0x23f   : > { %1290 = vlog2.f32 %v541_v9 }
 0x242   : > { %v543_v13 = vpop.xlane.xlu1 %542  ;;  %v537_v14 = vpop.xlane.xlu0 %536 }
 0x243   : > { %1292 = vlog2.f32 %v543_v13 }
 0x244   : > { %1294 = vrcp.f32 %v543_v13 }
 0x245   : > { %1296 = vrcp.f32 %v541_v9 }
 0x246   : > { %1298 = vlog2.f32 %v537_v14  ;;  %v539_v15 = vpop.xlane.xlu1 %538  ;;  %v533_v16 = vpop.xlane.xlu0 %532 }
 0x247   : > { %1300 = vlog2.f32 %v539_v15 }
 0x248   : > { %1302 = vrcp.f32 %v539_v15 }
 0x249   : > { %1304 = vlog2.f32 %v533_v16 }
 0x24a   : > { %1306 = vrcp.f32 %v533_v16  ;;  %v535_v18 = vpop.xlane.xlu1 %534  ;;  %v529_v19 = vpop.xlane.xlu0 %528 }
 0x24b   : > { %1308 = vlog2.f32 %v535_v18 }
 0x24c   : > { %1310 = vrcp.f32 %v535_v18  ;;  %v1291_v21 = vpop.eup %1290 }
 0x24d   : > { %1312 = vlog2.f32 %v529_v19  ;;  %v557_v34 = vmul.f32 0.6931472, %v1291_v21 }
 0x24e   : > { %v531_v20 = vpop.xlane.xlu1 %530 }
 0x24f   : > { %1314 = vlog2.f32 %v531_v20 }
 0x250   : > { %v1293_v22 = vpop.eup %1292  ;;  %1316 = vrcp.f32 %v531_v20 }
 0x251   : > { %v1295_v23 = vpop.eup %1294  ;;  %v559_v24 = vmul.f32 0.6931472, %v1293_v22  ;;  %1318 = vrcp.f32 %v537_v14 }
 0x252   : > { %v1297_v25 = vpop.eup %1296  ;;  %v1665_v28 = vmul.f32 %v1295_v23, %v1279_v2  ;;  %1320 = vrcp.f32 %v529_v19  ;;  %v660_v19 = vstv %s1086_s9 }
 0x253   : > { %v1299_v26 = vpop.eup %1298  ;;  %v1663_v27 = vsub.f32 %v1632_v47, %v559_v24  ;;  %v566_v47 = vsub.f32 %v1626_v41, %v557_v34  ;;  %v590_v55 = vmul.f32 %v1297_v25, %v1650_v0 }
 0x254   : > { %v1301_v29 = vpop.eup %1300  ;;  %v553_v49 = vmul.f32 0.6931472, %v1299_v26 }
 0x255   : > { %v1303_v30 = vpop.eup %1302  ;;  %v555_v31 = vmul.f32 0.6931472, %v1301_v29  ;;  %v599_v32 = vmul.f32 %v1665_v28, %v1663_v27  ;;  %v598_v41 = vmul.f32 %v590_v55, %v566_v47 }
 0x256   : > { %v1305_v33 = vpop.eup %1304  ;;  %v1672_v38 = vmul.f32 %v1303_v30, %v1281_v3 }
 0x257   : > { %v1307_v35 = vpop.eup %1306  ;;  %v549_v36 = vmul.f32 0.6931472, %v1305_v33  ;;  %614 = vadd.xlane.f32.xlu1 %v599_v32  ;;  %v1670_v37 = vsub.f32 %v1635_v50, %v555_v31 }
 0x258   : > { %v1309_v39 = vpop.eup %1308  ;;  %v1679_v46 = vmul.f32 %v1307_v35, %v1283_v4 }
 0x259   : > { %v1311_v40 = vpop.eup %1310  ;;  %v551_v42 = vmul.f32 0.6931472, %v1309_v39  ;;  %v597_v43 = vmul.f32 %v1672_v38, %v1670_v37  ;;  %v1677_v45 = vsub.f32 %v1638_v53, %v549_v36 }
 0x25a   : > { %v1313_v48 = vpop.eup %1312  ;;  %v1685_v52 = vmul.f32 %v1311_v40, %v1285_v6 }
 0x25b   : > { %610 = vadd.xlane.f32.xlu1 %v597_v43  ;;  %v594_v50 = vmul.f32 %v1679_v46, %v1677_v45  ;;  %v563_v51 = vsub.f32 %v1641_v56, %v551_v42  ;;  %v545_v61 = vmul.f32 0.6931472, %v1313_v48  ;;  %v564_v56 = vsub.f32 %v1629_v44, %v553_v49 }
 0x25c   : > { %v1315_v54 = vpop.eup %1314 }
 0x25d   : > { %v1317_v57 = vpop.eup %1316  ;;  %v547_v53 = vmul.f32 0.6931472, %v1315_v54  ;;  %604 = vadd.xlane.f32.xlu0 %v594_v50  ;;  %v595_v58 = vmul.f32 %v1685_v52, %v563_v51  ;;  %v1697_v9 = vsub.f32 %v1644_v59, %v545_v61  ;;  %v652_v59 = vshrl.u32 %v477_v17, 7 }
 0x25e   : > { %v1319_v60 = vpop.eup %1318  ;;  %v1691_v2 = vmul.f32 %v1317_v57, %v1659_v8 }
 0x25f   : > { %606 = vadd.xlane.f32.xlu1 %v595_v58  ;;  %v561_v63 = vsub.f32 %v1647_v62, %v547_v53  ;;  %v588_v0 = vmul.f32 %v1319_v60, %v1653_v1  ;;  %v1321_v4 = vpop.eup %1320  ;;  %v658_v15 = vadd.s32 48, %v652_v59  ;;  %v659_v16 = vadd.s32 56, %v652_v59 }
 0x260   : > { %v1700_v62 = vmul.f32 %v1321_v4, %v1656_v7  ;;  %v657_v29 = vadd.s32 40, %v652_v59  ;;  %v655_v33 = vadd.s32 24, %v652_v59  ;;  %v653_v42 = vadd.s32 8, %v652_v59 }
 0x261   : > { %612 = vadd.xlane.f32.xlu0 %v598_v41  ;;  %v593_v3 = vmul.f32 %v1691_v2, %v561_v63  ;;  %v596_v6 = vmul.f32 %v588_v0, %v564_v56  ;;  %v1711_v23 = vadd.s32 %v660_v19, %v658_v15  ;;  %v1713_v17 = vadd.s32 %v660_v19, %v659_v16 }
 0x262   : > { %v592_v8 = vmul.f32 %v1700_v62, %v1697_v9  ;;  %v666_v48 = vadd.s32 %v660_v19, %v657_v29  ;;  %v664_v54 = vadd.s32 %v660_v19, %v655_v33  ;;  %v662_v58 = vadd.s32 %v660_v19, %v653_v42 }
 0x263   : > { %602 = vadd.xlane.f32.xlu1 %v593_v3  ;;  %vm675_vm1 = vcmp.lt.s32.totalorder %v1711_v23, 200  ;;  %vm676_vm2 = vcmp.lt.s32.totalorder %v1713_v17, 200  ;;  %v891_v17 = vld [vmem:[%s1544_s27] sm:$0x1] }
 0x264   : > { %vm1727_vm4 = vmpackc.low %vm676_vm2, %vm675_vm1  ;;  %vm674_vm5 = vcmp.lt.s32.totalorder %v666_v48, 200  ;;  %vm670_vm10 = vcmp.lt.s32.totalorder %v662_v58, 200  ;;  %vm672_vm11 = vcmp.lt.s32.totalorder %v664_v54, 200 }
 0x265   : > { %608 = vadd.xlane.f32.xlu0 %v596_v6 }
 0x269   : > { %600 = vadd.xlane.f32.xlu0 %v592_v8 }
 0x296   : > { %705 = vxpose.xlu0.c.b16.start [1/4] (short) %v1579_v5, 128 }
 0x29a   : > { %706 = vxpose.xlu0.c.b16.cont [2/4] (short) %v1595_v10, 128 }
 0x29e   : > { %707 = vxpose.xlu0.c.b16.cont [3/4] (short) %v1598_v11, 128  ;;  %v656_v11 = vadd.s32 32, %v652_v59 }
 0x2a0   : > { %v665_v39 = vadd.s32 %v660_v19, %v656_v11 }
 0x2a2   : > { %708 = vxpose.xlu0.c.b16.end [4/4] (short) %v1603_v12, 128  ;;  %vm673_vm3 = vcmp.lt.s32.totalorder %v665_v39, 200 }
 0x2a3   : > { %vm1737_vm6 = vmpackc.low %vm674_vm5, %vm673_vm3 }
 0x2e0   : > { %v615_v44 = vpop.xlane.xlu1 %614 }
 0x2e1   : > { %v623_v13 = vsub.f32 0.0, %v615_v44 }
 0x2e3   : > { %v631_v5 = vadd.f32 %v623_v13, %v1663_v27  ;;  %v654_v27 = vadd.s32 16, %v652_v59 }
 0x2e4   : > { %v611_v1 = vpop.xlane.xlu1 %610 }
 0x2e5   : > { %v621_v18 = vsub.f32 0.0, %v611_v1  ;;  %v639_v32 = vmul.f32 %v631_v5, %v1665_v28 }
 0x2e6   : > { %v605_v14 = vpop.xlane.xlu0 %604 }
 0x2e7   : > { %v618_v22 = vsub.f32 0.0, %v605_v14  ;;  %v629_v24 = vadd.f32 %v621_v18, %v1670_v37  ;;  %v647_v50 = vmul.f32 5e-06, %v639_v32 }
 0x2e8   : > { %v607_v7 = vpop.xlane.xlu1 %606 }
 0x2e9   : > { %v619_v20 = vsub.f32 0.0, %v607_v7  ;;  %v626_v40 = vadd.f32 %v618_v22, %v1677_v45  ;;  %v637_v37 = vmul.f32 %v629_v24, %v1672_v38 }
 0x2ea   : > { %v613_v10 = vpop.xlane.xlu0 %612 }
 0x2eb   : > { %v622_v21 = vsub.f32 0.0, %v613_v10  ;;  %v627_v30 = vadd.f32 %v619_v20, %v563_v51  ;;  %v663_v51 = vadd.s32 %v660_v19, %v654_v27  ;;  %v634_v53 = vmul.f32 %v626_v40, %v1679_v46 }
 0x2ec   : > { %v603_v12 = vpop.xlane.xlu1 %602  ;;  %v645_v41 = vmul.f32 5e-06, %v637_v37 }
 0x2ed   : > { %v630_v25 = vadd.f32 %v622_v21, %v566_v47  ;;  %v617_v26 = vsub.f32 0.0, %v603_v12  ;;  %v635_v28 = vmul.f32 %v627_v30, %v1685_v52  ;;  %v661_v52 = vadd.s32 %v660_v19, %v652_v59 }
 0x2ee   : > { %v609_v31 = vpop.xlane.xlu0 %608  ;;  %vm671_vm8 = vcmp.lt.s32.totalorder %v663_v51, 200  ;;  %v642_v4 = vmul.f32 5e-06, %v634_v53  ;;  %v698_v20 = vsel %vm674_vm5, %v645_v41, 0.0  ;;  %v700_v12 = vsel %vm676_vm2, %v647_v50, 0.0 }
 0x2ef   : > { %v625_v34 = vadd.f32 %v617_v26, %v561_v63  ;;  %v620_v35 = vsub.f32 0.0, %v609_v31  ;;  %v638_v36 = vmul.f32 %v630_v25, %v590_v55  ;;  %vm669_vm9 = vcmp.lt.s32.totalorder %v661_v52, 200  ;;  %vm1093_vm12 = vmpackc.low %vm672_vm11, %vm671_vm8 }
 0x2f0   : > { %v695_v13 = vsel %vm671_vm8, %v642_v4, 0.0  ;;  %vm1096_vm13 = vmpackc.low %vm670_vm10, %vm669_vm9 }
 0x2f1   : > { %v628_v43 = vadd.f32 %v620_v35, %v564_v56  ;;  %v646_v47 = vmul.f32 5e-06, %v638_v36  ;;  %v633_v55 = vmul.f32 %v625_v34, %v1691_v2  ;;  %v643_v2 = vmul.f32 5e-06, %v635_v28 }
 0x2f2   : > { %v601_v49 = vpop.xlane.xlu0 %600 }
 0x2f3   : > { %v636_v57 = vmul.f32 %v628_v43, %v588_v0  ;;  %v616_v45 = vsub.f32 0.0, %v601_v49  ;;  %v1088_v60 = vpack.c.bf16 %v647_v50, %v646_v47  ;;  %v641_v46 = vmul.f32 5e-06, %v633_v55 }
 0x2f4   : > { %v1094_v8 = vpack.c.bf16 %v643_v2, %v642_v4  ;;  %v696_v15 = vsel %vm672_vm11, %v643_v2, 0.0  ;;  %v699_v11 = vsel %vm675_vm1, %v646_v47, 0.0 }
 0x2f5   : > { %v644_v61 = vmul.f32 5e-06, %v636_v57  ;;  %v624_v63 = vadd.f32 %v616_v45, %v1697_v9  ;;  %1163 = vmatprep.subr.msk.bf16.mxu1 %vm1727_vm4, %v1088_v60  ;;  %v694_v44 = vsel %vm670_vm10, %v641_v46, 0.0 }
 0x2f6   : > { %1164 = vmatpush3.bf16.msk.msra.mxu1 %vm1727_vm4, %v1088_v60 }
 0x2f7   : > { %v1091_v3 = vpack.c.bf16 %v645_v41, %v644_v61  ;;  %v632_v0 = vmul.f32 %v624_v63, %v1700_v62  ;;  %v697_v19 = vsel %vm673_vm3, %v644_v61, 0.0 }
 0x2f8   : > { %v713_v6 = vpop.trf.xlu0 }
 0x2f9   : > { %v640_v9 = vmul.f32 5e-06, %v632_v0  ;;  %1165 = vmatprep.subr.msk.bf16.mxu1 %vm1737_vm6, %v1091_v3  ;;  %1171 = vmatprep.mubr.msk.bf16.mxu1 %vm721_vm7, %v713_v6 }
 0x2fa   : > { %1166 = vmatpush3.bf16.msk.msra.mxu1 %vm1737_vm6, %v1091_v3 }
 0x2fb   : > { %v693_v62 = vsel %vm669_vm9, %v640_v9, 0.0  ;;  %1167 = vmatprep.subr.msk.bf16.mxu1 %vm1093_vm12, %v1094_v8  ;;  %v1097_v14 = vpack.c.bf16 %v641_v46, %v640_v9 }
 0x2fc   : > { %v892_v59 = vadd.f32 %v694_v44, %v693_v62  ;;  %v714_v1 = vpop.trf.xlu0 }
 0x2fe   : > { %v893_v7 = vadd.f32 %v892_v59, %v695_v13  ;;  %1168 = vmatpush3.bf16.msk.msra.mxu1 %vm1093_vm12, %v1094_v8 }
 0x2ff   : > { %1169 = vmatprep.subr.msk.bf16.mxu1 %vm1096_vm13, %v1097_v14 }
 0x300   : > { %v894_v16 = vadd.f32 %v893_v7, %v696_v15  ;;  %v715_v18 = vpop.trf.xlu0 }
 0x302   : > { %v895_v5 = vadd.f32 %v894_v16, %v697_v19  ;;  %1170 = vmatpush3.bf16.msk.msra.mxu1 %vm1096_vm13, %v1097_v14 }
 0x304   : > { %v896_v10 = vadd.f32 %v895_v5, %v698_v20  ;;  %v716_v21 = vpop.trf.xlu0 }
 0x305   : > { %1172 = vmatmul.mubr.msk.bf16.vlgmr.msra.gmra.mxu1 %vm721_vm7, %v714_v1 }
 0x306   : > { %v897_v22 = vadd.f32 %v896_v10, %v699_v11  ;;  %1175 = vmatprep.mubr.msk.bf16.mxu1 %vm721_vm7, %v715_v18 }
 0x308   : > { %v898_v24 = vadd.f32 %v897_v22, %v700_v12  ;;  %v717_v25 = vpop.trf.xlu0 }
 0x30a   : > { %v899_v26 = vrot.slane %v898_v24, 4 }
 0x30c   : > { %v900_v29 = vadd.f32 %v899_v26, %v898_v24  ;;  %v718_v23 = vpop.trf.xlu0 }
 0x30d   : > { %1176 = vmatmul.mubr.msk.bf16.gmra.mxu1 %vm721_vm7, %v716_v21 }
 0x30e   : > { %v901_v30 = vrot.slane %v900_v29, 2  ;;  %1179 = vmatprep.mubr.msk.bf16.mxu1 %vm721_vm7, %v717_v25 }
 0x310   : > { %v902_v31 = vadd.f32 %v901_v30, %v900_v29  ;;  %v719_v33 = vpop.trf.xlu0 }
 0x312   : > { %v903_v32 = vrot.slane %v902_v31, 1 }
 0x314   : > { %v904_v27 = vadd.f32 %v903_v32, %v902_v31  ;;  %v720_v35 = vpop.trf.xlu0 }
 0x315   : > { %1180 = vmatmul.mubr.msk.bf16.gmra.mxu1 %vm721_vm7, %v718_v23 }
 0x316   : > { %v905_v34 = vadd.f32 %v904_v27, %v891_v17  ;;  %1183 = vmatprep.mubr.msk.bf16.mxu1 %vm721_vm7, %v719_v33 }
 0x318   : > { %906 = vst [vmem:[%s1544_s27] sm:$0x1] %v905_v34  ;;  %s1417_s27 = smov [#allocation2]  }
 0x319   : > { %s1326_s24 = sshll.u32 %s1417_s27, 4  ;;  %s1327_s24 = int_to_ptr.vmem [resolvable:$false] %s1326_s24 }
 0x31a   : > { %s1328_s17 = scalar_lea.vmem %s1327_s24, 2048  ;;  %p1329_p4 = scmp.lt.s32.totalorder %s1779_s6, %s1327_s24 }
 0x31b   : > { %p1330_p6 = scmp.lt.s32.totalorder %s1328_s17, %s1322_s22 }
 0x31d   : > { %1184 = vmatmul.mubr.msk.bf16.gmra.mxu1 %vm721_vm7, %v720_v35  ;;  %p1331_p8 = por %p1330_p6, %p1329_p4 }
 0x31f   : > { %p1332_p9 = pnand %p1331_p8, %p1325_p3 }
 0x321   : > { %1335 = shalt.err (!%p1332_p9)
}
 0x322   : > { %s1336_s14 = scalar_lea.hbm %s1777_s12, 1024  ;;  %s1340_s29 = scalar_lea.hbm %s1869_s3, 4096 }
 0x323   : > { %p1337_p10 = scmp.ne.s32.totalorder %s1777_s12, %s1336_s14  ;;  %p1341_p13 = scmp.lt.s32.totalorder %s1777_s12, %s1869_s3 }
 0x324   : > { %p1342_p0 = scmp.lt.s32.totalorder %s1340_s29, %s1336_s14 }
 0x325   : > { %p1338_p11 = pnand %p1337_p10, %p1503_p5 }
 0x326   : > { %p1343_p1 = por %p1342_p0, %p1341_p13 }
 0x327   : > { %p1339_p12 = pneg %p1338_p11 }
 0x329   : > { %p1344_p2 = pnand %p1343_p1, %p1339_p12 }
 0x32b   : > { %1347 = shalt.err (!%p1344_p2)
}
 0x32c   : > { %s1418_s10 = smov 128   ;;  %s1419_s11 = smov 8   ;;  %v845_v36 = vld [vmem:[%s1539_s28 + $0x10] sm:$0xff]  ;;  %v843_v40 = vld [vmem:[%s1539_s28] sm:$0xff]  ;;  %v846_v43 = vld [vmem:[%s1539_s28 + $0x18] sm:$0xff] }
 0x32d   : > { %1187 = dma.vmem_to_hbm [thread:$0]  (%p1503_p5), %s1779_s6, 1024, %s1777_s12, %s1783_s21, %s1418_s10, %s1418_s10, %s1419_s11  }
 0x32e   : > { %v844_v28 = vld [vmem:[%s1539_s28 + $0x8] sm:$0xff]  ;;  %v849_v51 = vld [vmem:[%s1539_s28 + $0x30] sm:$0xff]  ;;  %v847_v57 = vld [vmem:[%s1539_s28 + $0x20] sm:$0xff] }
 0x32f   : > { %v850_v53 = vld [vmem:[%s1539_s28 + $0x38] sm:$0xff]  ;;  %v848_v60 = vld [vmem:[%s1539_s28 + $0x28] sm:$0xff]  ;;  %v853_v63 = vld [vmem:[%s1539_s28 + $0x50] sm:$0xff] }
 0x330   : > { %v851_v46 = vld [vmem:[%s1539_s28 + $0x40] sm:$0xff]  ;;  %v854_v4 = vld [vmem:[%s1539_s28 + $0x58] sm:$0xff]  ;;  %v852_v8 = vld [vmem:[%s1539_s28 + $0x48] sm:$0xff] }
 0x331   : > { %v857_v59 = vld [vmem:[%s1539_s28 + $0x70] sm:$0xff]  ;;  %v855_v14 = vld [vmem:[%s1539_s28 + $0x60] sm:$0xff]  ;;  %v858_v16 = vld [vmem:[%s1539_s28 + $0x78] sm:$0xff] }
 0x332   : > { %v856_v5 = vld [vmem:[%s1539_s28 + $0x68] sm:$0xff] }
 0x3c5   : > { %v1173_v39 = vpop.f32.mrf.mxu1 }
 0x3c6   : > { %v861_v42 = vadd.f32 %v1173_v39, %v845_v36 }
 0x3c7   : > { %v780_v37 = vpop.f32.mrf.mxu1 }
 0x3c8   : > { %877 = vst [vmem:[%s1539_s28 + $0x10] sm:$0xff] %v861_v42  ;;  %v859_v47 = vadd.f32 %v843_v40, %v780_v37 }
 0x3c9   : > { %v1174_v48 = vpop.f32.mrf.mxu1 }
 0x3ca   : > { %875 = vst [vmem:[%s1539_s28] sm:$0xff] %v859_v47  ;;  %v862_v49 = vadd.f32 %v1174_v48, %v846_v43 }
 0x3cb   : > { %v783_v50 = vpop.f32.mrf.mxu1 }
 0x3cc   : > { %878 = vst [vmem:[%s1539_s28 + $0x18] sm:$0xff] %v862_v49  ;;  %v860_v54 = vadd.f32 %v844_v28, %v783_v50 }
 0x3cd   : > { %v1177_v55 = vpop.f32.mrf.mxu1 }
 0x3ce   : > { %876 = vst [vmem:[%s1539_s28 + $0x8] sm:$0xff] %v860_v54  ;;  %v865_v45 = vadd.f32 %v1177_v55, %v849_v51 }
 0x3cf   : > { %v796_v38 = vpop.f32.mrf.mxu1 }
 0x3d0   : > { %881 = vst [vmem:[%s1539_s28 + $0x30] sm:$0xff] %v865_v45  ;;  %v863_v52 = vadd.f32 %v847_v57, %v796_v38 }
 0x3d1   : > { %v1178_v58 = vpop.f32.mrf.mxu1 }
 0x3d2   : > { %879 = vst [vmem:[%s1539_s28 + $0x20] sm:$0xff] %v863_v52  ;;  %v866_v41 = vadd.f32 %v1178_v58, %v850_v53 }
 0x3d3   : > { %v799_v61 = vpop.f32.mrf.mxu1 }
 0x3d4   : > { %882 = vst [vmem:[%s1539_s28 + $0x38] sm:$0xff] %v866_v41  ;;  %v864_v2 = vadd.f32 %v848_v60, %v799_v61 }
 0x3d5   : > { %v1181_v56 = vpop.f32.mrf.mxu1 }
 0x3d6   : > { %880 = vst [vmem:[%s1539_s28 + $0x28] sm:$0xff] %v864_v2  ;;  %v869_v3 = vadd.f32 %v1181_v56, %v853_v63 }
 0x3d7   : > { %v812_v0 = vpop.f32.mrf.mxu1 }
 0x3d8   : > { %885 = vst [vmem:[%s1539_s28 + $0x50] sm:$0xff] %v869_v3  ;;  %v867_v6 = vadd.f32 %v851_v46, %v812_v0 }
 0x3d9   : > { %v1182_v9 = vpop.f32.mrf.mxu1 }
 0x3da   : > { %883 = vst [vmem:[%s1539_s28 + $0x40] sm:$0xff] %v867_v6  ;;  %v870_v62 = vadd.f32 %v1182_v9, %v854_v4 }
 0x3db   : > { %v815_v44 = vpop.f32.mrf.mxu1 }
 0x3dc   : > { %886 = vst [vmem:[%s1539_s28 + $0x58] sm:$0xff] %v870_v62  ;;  %v868_v1 = vadd.f32 %v852_v8, %v815_v44 }
 0x3dd   : > { %v1185_v13 = vpop.f32.mrf.mxu1 }
 0x3de   : > { %884 = vst [vmem:[%s1539_s28 + $0x48] sm:$0xff] %v868_v1  ;;  %v873_v7 = vadd.f32 %v1185_v13, %v857_v59 }
 0x3df   : > { %v828_v15 = vpop.f32.mrf.mxu1 }
 0x3e0   : > { %889 = vst [vmem:[%s1539_s28 + $0x70] sm:$0xff] %v873_v7  ;;  %v871_v18 = vadd.f32 %v855_v14, %v828_v15 }
 0x3e1   : > { %v1186_v19 = vpop.f32.mrf.mxu1 }
 0x3e2   : > { %887 = vst [vmem:[%s1539_s28 + $0x60] sm:$0xff] %v871_v18  ;;  %v874_v20 = vadd.f32 %v1186_v19, %v858_v16 }
 0x3e3   : > { %v831_v10 = vpop.f32.mrf.mxu1 }
 0x3e4   : > { %890 = vst [vmem:[%s1539_s28 + $0x78] sm:$0xff] %v874_v20  ;;  %v872_v21 = vadd.f32 %v856_v5, %v831_v10 }
 0x3e6   : > { %888 = vst [vmem:[%s1539_s28 + $0x68] sm:$0xff] %v872_v21 }
 0x3e7 PF: > { %p1193_p5 = scmp.ge.s32.totalorder %s1414_s25, 2  ;;  %s952_s7 = sand.u32 1, %s1386_s18  }
 0x3e8   : > { %s953_s6 = scalar_lea.sflag [#allocation3], %s952_s7 }
 0x3e9   : > { %p1190_p3 = pnand %p1193_p5, %p1509_p7 }
 0x3eb   : > { %p1191_p4 = pneg %p1190_p3 }
 0x3ed   : > { %1381 = dma.done.wait (%p1191_p4), %s953_s6, 1024  }
 0x3ee   : > { %1383 = vsyncadd (%p1191_p4), %s953_s6, 4294966272  ;;  %s19_s25 = sadd.s32 1, %s1414_s25   ;;  %s1886_s22 = sld [smem:[#allocation5_spill]] }
 0x3ef   : > { %p16_p6 = scmp.ge.s32.totalorder %s19_s25, 6   ;;  %s1887_s28 = sld [smem:[#allocation6_spill]] }
 0x3f0   : > { %s1888_s24 = sld [smem:[#allocation7_spill]]  ;;  %s1889_s18 = smov %s1390_s19 }
 0x3f1   : > { %s1890_s19 = smov %s1394_s20  ;;  %s1891_s20 = smov %s1519_s13 }
 0x3f2   : > { %s1892_s21 = smov %s1406_s23  ;;  %18 = sbr.rel (!%p16_p6) target bundleno = 5 (0x5), region = 95 }
 0x3f5   : > { %s1893_s23 = smov %s1887_s28 }
 0x3f7   :  { %972 = vsyncpa [#allocation3], 1 }
 0x3f8   :  { %974 = vsyncpa [#allocation3 + $0x1], 1 }

</bundles_post_ra>
